<compile_context>
chip_gen: v7x
topology: tpu7x:2x2x1
jax: 0.10.0
libtpu: 0.0.40
codegen_flags: <defaults>
</compile_context>

<pallas_src>
import functools

import jax
import jax.numpy as jnp
from jax.experimental import pallas as pl
from jax.experimental.pallas import tpu as pltpu


def _clf_head_kernel(hidden_ref, w_ref, b_ref, label_ref, logit_ref, bce_ref):
    """One grid step processes TM examples.

    hidden_ref : [TM, S, H]  encoder last_hidden_state block (VMEM)
    w_ref      : [1, H]      cls_layer weight, lane-dense row (VMEM)
    b_ref      : [1, 1]      cls_layer bias (SMEM scalar)
    label_ref  : [TM, 1]     binary labels (VMEM)
    logit_ref  : [TM, 1]     per-example logits (output)
    bce_ref    : [TM, 1]     per-example BCE-with-logits terms (output)
    """
    h = hidden_ref[...].astype(jnp.float32)          # [TM, S, H]
    w = w_ref[...]                                   # [1, H]

    # torch.mean(last_hidden_state, dim=1): sum over S (sublane reduce) * 1/S.
    pooled = jnp.sum(h, axis=1) * (1.0 / h.shape[1])            # [TM, H]

    # nn.Dropout(0.1): identity in eval / deterministic mode (no scaling).
    # cls_layer Linear(H, 1): VPU multiply + lane reduce (no 1x1 MXU matmul).
    x = jnp.sum(pooled * w, axis=1, keepdims=True) + b_ref[0, 0]  # [TM, 1]
    logit_ref[...] = x

    # BCEWithLogitsLoss element terms (numerically stable); mean over the N
    # valid examples is taken in the wrapper (padded tail is sliced off there).
    y = label_ref[...]
    bce_ref[...] = jnp.maximum(x, 0.0) - x * y + jnp.log1p(jnp.exp(-jnp.abs(x)))


def _pick_block_m(n, s, h, itemsize, vmem_budget_bytes=24 << 20):
    """Pick TM (examples per block) against a double-buffered VMEM budget."""
    per_example = max(1, s * h * itemsize)
    tm = vmem_budget_bytes // (2 * per_example)      # hidden input is double-buffered
    tm = int(max(1, min(tm, 256)))
    if tm >= 8:
        tm = (tm // 8) * 8                           # sublane-aligned (TM, 1) blocks
        n_aligned = ((n + 7) // 8) * 8
        tm = min(tm, n_aligned)                      # no point far past the problem size
    return tm


@functools.partial(jax.jit, static_argnames=("sample_size", "block_m"))
def relation_concat_forward(hidden_states, cls_w, cls_b, clf_labels,
                            gen_loss, sample_size, block_m=None):
    """Pallas-backed forward of the classification branch + loss combination.

    hidden_states : [N, S, H] float32 / bfloat16, N = gen_batch * sample_size
    cls_w         : [H, 1]    float32 (torch Linear weight, transposed)
    cls_b         : [1, 1]    float32
    clf_labels    : [N, 1]    float32 (0/1)
    gen_loss      : scalar    (placeholder for the T5 generation loss)
    Returns (total_loss, clf_loss, clf_predict_logits[B, sample_size], keep_mask)
    """
    N, S, H = hidden_states.shape
    B = N // sample_size

    if block_m is None:
        block_m = _pick_block_m(N, S, H, hidden_states.dtype.itemsize)
    tm = int(block_m)

    n_pad = pl.cdiv(N, tm) * tm
    nb = n_pad // tm

    labels_col = clf_labels.reshape(N, 1).astype(jnp.float32)
    if n_pad != N:
        hidden_states = jnp.pad(hidden_states,
                                ((0, n_pad - N), (0, 0), (0, 0)))
        labels_col = jnp.pad(labels_col, ((0, n_pad - N), (0, 0)))

    # Lane-dense weight row [1, H]; scalar bias goes to SMEM.
    w_row = cls_w.reshape(1, H).astype(jnp.float32)
    b_scalar = cls_b.reshape(1, 1).astype(jnp.float32)

    logits_col, bce_col = pl.pallas_call(
        _clf_head_kernel,
        out_shape=(jax.ShapeDtypeStruct((n_pad, 1), jnp.float32),
                   jax.ShapeDtypeStruct((n_pad, 1), jnp.float32)),
        grid=(nb,),
        in_specs=[
            pl.BlockSpec((tm, S, H), lambda i: (i, 0, 0)),          # hidden block
            pl.BlockSpec((1, H), lambda i: (0, 0)),                 # weight row
            pl.BlockSpec(memory_space=pltpu.MemorySpace.SMEM),      # bias scalar
            pl.BlockSpec((tm, 1), lambda i: (i, 0)),                # labels block
        ],
        out_specs=(
            pl.BlockSpec((tm, 1), lambda i: (i, 0)),                # logits
            pl.BlockSpec((tm, 1), lambda i: (i, 0)),                # per-example BCE
        ),
        compiler_params=pltpu.CompilerParams(
            dimension_semantics=("parallel",),
            vmem_limit_bytes=32 * 1024 * 1024,
        ),
    )(hidden_states, w_row, b_scalar, labels_col)

    logits = logits_col[:N, 0]                                      # [N]
    clf_loss = jnp.sum(bce_col[:N, 0]) / N                          # mean over N (not N_pad)

    # torch.reshape(clf_predict_logits, (B, sample_size, -1)).squeeze(2)
    clf_predict_logits = logits.reshape(B, sample_size)
    # filter_candidates_by_classification_results: keep where logits > 0 (BCE path)
    # TODO(synk): the string-level candidate filtering / relation concatenation
    #             itself is python string work and not expressible on TPU.
    keep_mask = clf_predict_logits > 0.0
    total_loss = gen_loss + clf_loss
    return total_loss, clf_loss, clf_predict_logits, keep_mask


if __name__ == "__main__":
    # Small, deterministic synthetic shapes consistent with the module.
    gen_batch = 2          # input_ids_gen.size(0)
    sample_size = 4        # candidate relations per question
    N = gen_batch * sample_size
    S = 8                  # clf encoder sequence length
    H = 32                 # hidden_size (t5 hidden, shrunk)

    key = jax.random.PRNGKey(0)
    k_h, k_w, k_b, k_y = jax.random.split(key, 4)

    # Stand-in for self.t5.encoder(...).last_hidden_state
    hidden_states = jax.random.normal(k_h, (N, S, H), dtype=jnp.float32)

    # nn.Linear(H, 1) init: uniform(-1/sqrt(H), 1/sqrt(H))
    bound = 1.0 / (H ** 0.5)
    cls_w = jax.random.uniform(k_w, (H, 1), jnp.float32, -bound, bound)
    cls_b = jax.random.uniform(k_b, (1, 1), jnp.float32, -bound, bound)

    # Binary classification labels (BCEWithLogitsLoss path)
    clf_labels = jax.random.bernoulli(k_y, 0.5, (N, 1)).astype(jnp.float32)

    # TODO(synk): gen_loss would come from the full T5ForConditionalGeneration
    # forward on the concatenated relation-augmented inputs; use 0 here.
    gen_loss = jnp.float32(0.0)

    total_loss, clf_loss, clf_logits, keep_mask = relation_concat_forward(
        hidden_states, cls_w, cls_b, clf_labels, gen_loss,
        sample_size=sample_size)
    jax.block_until_ready((total_loss, clf_loss, clf_logits, keep_mask))

    # Plain-JAX reference check of the same math.
    pooled_ref = jnp.mean(hidden_states, axis=1)                       # [N, H]
    logits_ref = pooled_ref @ cls_w + cls_b[0, 0]                      # [N, 1]
    bce_ref = jnp.mean(jnp.maximum(logits_ref, 0.0) - logits_ref * clf_labels
                       + jnp.log1p(jnp.exp(-jnp.abs(logits_ref))))
    assert jnp.allclose(clf_logits.reshape(-1, 1), logits_ref, atol=1e-5), "logit mismatch"
    assert jnp.allclose(clf_loss, bce_ref, atol=1e-5), "loss mismatch"
    assert jnp.allclose(total_loss, gen_loss + bce_ref, atol=1e-5), "total loss mismatch"
    assert jnp.array_equal(keep_mask, (logits_ref.reshape(gen_batch, sample_size) > 0.0)), \
        "mask mismatch"

    print("KERNEL_OK")
</pallas_src>

<mosaic_0001>
module attributes {stable_mosaic.version = 11 : i64} {
  func.func @_clf_head_kernel(%arg0: i32, %arg1: memref<8x8x32xf32, #tpu.memory_space<vmem>>, %arg2: memref<1x32xf32, #tpu.memory_space<vmem>>, %arg3: memref<1x1xf32, #tpu.memory_space<smem>>, %arg4: memref<8x1xf32, #tpu.memory_space<vmem>>, %arg5: memref<8x1xf32, #tpu.memory_space<vmem>>, %arg6: memref<8x1xf32, #tpu.memory_space<vmem>>) attributes {dimension_semantics = [#tpu.dimension_semantics<parallel>], iteration_bounds = array<i64: 1>, scalar_prefetch = 0 : i64, scratch_operands = 0 : i64, tpu.core_type = #tpu.core_type<tc>, window_params = [{transform_indices = @transform_0, window_bounds = array<i64: 8, 8, 32>}, {pipeline_mode = #tpu.pipeline_mode<synchronous>, transform_indices = @transform_1, window_bounds = array<i64: 1, 32>}, {transform_indices = @transform_2, window_bounds = array<i64: 1, 1>}, {transform_indices = @transform_3, window_bounds = array<i64: 8, 1>}, {transform_indices = @transform_4, window_bounds = array<i64: 8, 1>}, {transform_indices = @transform_5, window_bounds = array<i64: 8, 1>}]} {
    %c0 = arith.constant 0 : index
    %c0_0 = arith.constant 0 : index
    %c0_1 = arith.constant 0 : index
    %0 = vector.load %arg1[%c0, %c0_0, %c0_1] : memref<8x8x32xf32, #tpu.memory_space<vmem>>, vector<8x8x32xf32>
    %c0_2 = arith.constant 0 : index
    %c0_3 = arith.constant 0 : index
    %1 = vector.load %arg2[%c0_2, %c0_3] : memref<1x32xf32, #tpu.memory_space<vmem>>, vector<1x32xf32>
    %cst = arith.constant dense<0.000000e+00> : vector<8x32xf32>
    %2 = vector.multi_reduction <add>, %0, %cst [1] : vector<8x8x32xf32> to vector<8x32xf32>
    %cst_4 = arith.constant 1.250000e-01 : f32
    %3 = vector.broadcast %cst_4 : f32 to vector<8x32xf32>
    %4 = arith.mulf %2, %3 : vector<8x32xf32>
    %5 = vector.broadcast %1 : vector<1x32xf32> to vector<8x32xf32>
    %6 = arith.mulf %4, %5 : vector<8x32xf32>
    %cst_5 = arith.constant dense<0.000000e+00> : vector<8xf32>
    %7 = vector.multi_reduction <add>, %6, %cst_5 [1] : vector<8x32xf32> to vector<8xf32>
    %8 = vector.shape_cast %7 : vector<8xf32> to vector<8x1xf32>
    %c0_6 = arith.constant 0 : index
    %c0_7 = arith.constant 0 : index
    %9 = memref.load %arg3[%c0_6, %c0_7] : memref<1x1xf32, #tpu.memory_space<smem>>
    %10 = vector.broadcast %9 : f32 to vector<8x1xf32>
    %11 = arith.addf %8, %10 : vector<8x1xf32>
    %c0_8 = arith.constant 0 : index
    %c0_9 = arith.constant 0 : index
    %12 = vector.load %arg5[%c0_8, %c0_9] : memref<8x1xf32, #tpu.memory_space<vmem>>, vector<8x1xf32>
    tpu.vector_store %arg5[%c0_8, %c0_9], %11 {strides = array<i32>} : memref<8x1xf32, #tpu.memory_space<vmem>>, vector<8x1xf32>,
    %c0_10 = arith.constant 0 : index
    %c0_11 = arith.constant 0 : index
    %13 = vector.load %arg4[%c0_10, %c0_11] : memref<8x1xf32, #tpu.memory_space<vmem>>, vector<8x1xf32>
    %cst_12 = arith.constant 0.000000e+00 : f32
    %14 = vector.broadcast %cst_12 : f32 to vector<8x1xf32>
    %15 = arith.maximumf %11, %14 : vector<8x1xf32>
    %16 = arith.mulf %11, %13 : vector<8x1xf32>
    %17 = arith.subf %15, %16 : vector<8x1xf32>
    %18 = math.absf %11 : vector<8x1xf32>
    %cst_13 = arith.constant 0.000000e+00 : f32
    %19 = vector.broadcast %cst_13 : f32 to vector<8x1xf32>
    %20 = arith.subf %19, %18 : vector<8x1xf32>
    %21 = math.exp %20 : vector<8x1xf32>
    %22 = math.log1p %21 : vector<8x1xf32>
    %23 = arith.addf %17, %22 : vector<8x1xf32>
    %c0_14 = arith.constant 0 : index
    %c0_15 = arith.constant 0 : index
    %24 = vector.load %arg6[%c0_14, %c0_15] : memref<8x1xf32, #tpu.memory_space<vmem>>, vector<8x1xf32>
    tpu.vector_store %arg6[%c0_14, %c0_15], %23 {strides = array<i32>} : memref<8x1xf32, #tpu.memory_space<vmem>>, vector<8x1xf32>,
    return
  }
  func.func @transform_0(%arg0: i32) -> (i32, i32, i32) {
    %c0_i32 = arith.constant 0 : i32
    %c0_i32_0 = arith.constant 0 : i32
    %c0_i32_1 = arith.constant 0 : i32
    return %arg0, %c0_i32, %c0_i32_0 : i32, i32, i32
  }
  func.func @transform_1(%arg0: i32) -> (i32, i32) {
    %c0_i32 = arith.constant 0 : i32
    %c0_i32_0 = arith.constant 0 : i32
    %c0_i32_1 = arith.constant 0 : i32
    return %c0_i32, %c0_i32_0 : i32, i32
  }
  func.func @transform_2(%arg0: i32) -> (i32, i32) {
    %c0_i32 = arith.constant 0 : i32
    %c0_i32_0 = arith.constant 0 : i32
    %c0_i32_1 = arith.constant 0 : i32
    return %c0_i32, %c0_i32_0 : i32, i32
  }
  func.func @transform_3(%arg0: i32) -> (i32, i32) {
    %c0_i32 = arith.constant 0 : i32
    %c0_i32_0 = arith.constant 0 : i32
    return %arg0, %c0_i32 : i32, i32
  }
  func.func @transform_4(%arg0: i32) -> (i32, i32) {
    %c0_i32 = arith.constant 0 : i32
    %c0_i32_0 = arith.constant 0 : i32
    return %arg0, %c0_i32 : i32, i32
  }
  func.func @transform_5(%arg0: i32) -> (i32, i32) {
    %c0_i32 = arith.constant 0 : i32
    %c0_i32_0 = arith.constant 0 : i32
    return %arg0, %c0_i32 : i32, i32
  }
}

</mosaic_0001>

<bundles_post_ra>
// kernel: squeeze.3
= control target key start
LH: loop header
LB: loop body
LE: loop exit
PB: predicated region body
PF: predicated region fallthrough
CT: control target
= control target key end

     0   :  { %vm7_vm0 = vcmask 31744   ;;  %s39_s0 = inlined_call_operand.vmem [shape: f32[8], index: 0, kind: input, shape index: {}]   ;;  %s40_s1 = inlined_call_operand.vmem [shape: f32[2,4], index: 1, kind: output, shape index: {}]  }
   0x1   :  { %v4_v0 = vld [vmem:[%s39_s0] sm:$0x1]  ;;  %s22_s0 = smov 124  }
   0x2   :  { %5 = vst [vmem:[#allocation1] sm:$0x1] %v4_v0 }
   0x9   :  { %v9_v1 = vld [vmem:[#allocation1] sm:$0x1]  }
   0xa   :  { %v6_v2 = vld [vmem:[#allocation1] sm:$0x1]   ;;  %10 = vrot.lane.b32.xlu0 %v9_v1, %s22_s0 }
   0xb   :  { %8 = vst.msk [vmem:[#allocation0] sm:$0x1] %vm7_vm0, %v6_v2  }
  0x7c   :  { %v11_v3 = vpop.permute.xlu0 %10  }
  0x7d   :  { %14 = vst.msk [vmem:[#allocation0 + $0x1] sm:$0x1] %vm7_vm0, %v11_v3  }
  0x84   :  { %v18_v4 = vld [vmem:[#allocation0] sm:$0x3] }
  0x85   :  { %20 = vst [vmem:[%s40_s1] sm:$0x3] %v18_v4 }

// kernel: relation_concat_forward.1
= control target key start
LH: loop header
LB: loop body
LE: loop exit
PB: predicated region body
PF: predicated region fallthrough
CT: control target
= control target key end

     0   :  { %12 = vsyncpa [#allocation4], 0  ;;  %s220_s18 = smov [#allocation3]   ;;  %s294_s0 = inlined_call_operand.hbm [shape: f32[8,8,32], index: 0, kind: input, shape index: {}]   ;;  %s295_s1 = inlined_call_operand.vmem [shape: f32[1,32], index: 1, kind: input, shape index: {}]   ;;  %s296_s2 = inlined_call_operand.<no memory space> [shape: f32[1,1], index: 2, kind: input, shape index: {}]   ;;  %s297_s3 = inlined_call_operand.vmem [shape: f32[8,1], index: 3, kind: input, shape index: {}]   ;;  %s298_s4 = inlined_call_operand.vmem [shape: f32[8,1], index: 4, kind: output, shape index: {0}]   ;;  %s299_s5 = inlined_call_operand.vmem [shape: f32[8,1], index: 5, kind: output, shape index: {1}]  }
   0x1   :  { %s18_s19 = sshll.u32 %s220_s18, 4  ;;  %s196_s22 = scalar_lea.hbm %s294_s0, 1024  ;;  %s19_s19 = int_to_ptr.vmem [resolvable:$true] %s18_s19 }
   0x2   :  { %p197_p0 = scmp.ne.s32.totalorder %s294_s0, %s196_s22  ;;  %p200_p1 = scmp.lt.u32.totalorder %s196_s22, %s294_s0 }
   0x4   :  { %p202_p2 = pnand %p200_p1, %p197_p0 }
   0x6   :  { %205 = shalt.err (!%p202_p2)
}
   0x7   :  { %s206_s27 = scalar_lea.vmem %s19_s19, 1024  ;;  %p211_p4 = scmp.lt.s32.totalorder %s19_s19, %s19_s19 }
   0x8   :  { %p207_p3 = scmp.ne.s32.totalorder %s19_s19, %s206_s27  ;;  %p212_p5 = scmp.lt.s32.totalorder %s206_s27, %s206_s27 }
   0xa   :  { %p213_p6 = por %p212_p5, %p211_p4 }
   0xc   :  { %p214_p7 = pnand %p213_p6, %p207_p3 }
   0xe   :  { %217 = shalt.err (!%p214_p7)
}
   0xf   :  { %s221_s28 = smov 128   ;;  %s222_s29 = smov 8  }
  0x10   :  { %24 = dma.hbm_to_vmem [thread:$0]  %s294_s0, 1024, %s19_s19, [#allocation4], %s221_s28, %s221_s28, %s222_s29  }
  0x11   :  { %218 = dma.done.wait [#allocation4], 1024  }
  0x12   :  { %219 = vsyncadd [#allocation4], 4294966272  ;;  %vm43_vm0 = vcmask 261120   ;;  %v34_v0 = vld [vmem:[#allocation3] sm:$0xff]  ;;  %v35_v1 = vld [vmem:[#allocation3 + $0x8] sm:$0xff]  ;;  %vm131_vm1 = vcmask 1041409  }
  0x13   :  { %v36_v2 = vld [vmem:[#allocation3 + $0x10] sm:$0xff]  ;;  %v37_v3 = vld [vmem:[#allocation3 + $0x18] sm:$0xff]  ;;  %v38_v4 = vld [vmem:[#allocation3 + $0x20] sm:$0xff]  ;;  %v44_v6 = vsel %vm43_vm0, %v34_v0, 0.0  ;;  %v51_v7 = vsel %vm43_vm0, %v35_v1, 0.0  ;;  %vm134_vm2 = vcmask 1042434  }
  0x14   :  { %v39_v5 = vld [vmem:[#allocation3 + $0x28] sm:$0xff]  ;;  %v58_v8 = vsel %vm43_vm0, %v36_v2, 0.0  ;;  %v40_v9 = vld [vmem:[#allocation3 + $0x30] sm:$0xff]  ;;  %v41_v10 = vld [vmem:[#allocation3 + $0x38] sm:$0xff]  ;;  %v45_v11 = vrot.slane %v44_v6, 4  ;;  %v52_v12 = vrot.slane %v51_v7, 4 }
  0x15   :  { %v59_v13 = vrot.slane %v58_v8, 4  ;;  %v65_v14 = vsel %vm43_vm0, %v37_v3, 0.0  ;;  %v72_v15 = vsel %vm43_vm0, %v38_v4, 0.0  ;;  %v79_v16 = vsel %vm43_vm0, %v39_v5, 0.0  ;;  %v188_v53 = vld [vmem:[%s295_s1] ss:$0 sm:$0xff] }
  0x16   :  { %v46_v17 = vadd.f32 %v45_v11, %v44_v6  ;;  %v53_v18 = vadd.f32 %v52_v12, %v51_v7  ;;  %v66_v19 = vrot.slane %v65_v14, 4  ;;  %v73_v20 = vrot.slane %v72_v15, 4 }
  0x17   :  { %v60_v21 = vadd.f32 %v59_v13, %v58_v8  ;;  %v80_v22 = vrot.slane %v79_v16, 4  ;;  %v86_v23 = vsel %vm43_vm0, %v40_v9, 0.0  ;;  %v93_v24 = vsel %vm43_vm0, %v41_v10, 0.0 }
  0x18   :  { %v47_v25 = vrot.slane %v46_v17, 2  ;;  %v54_v26 = vrot.slane %v53_v18, 2  ;;  %v67_v27 = vadd.f32 %v66_v19, %v65_v14  ;;  %v74_v28 = vadd.f32 %v73_v20, %v72_v15 }
  0x19   :  { %v61_v29 = vrot.slane %v60_v21, 2  ;;  %v81_v30 = vadd.f32 %v80_v22, %v79_v16  ;;  %v87_v31 = vrot.slane %v86_v23, 4  ;;  %v94_v32 = vrot.slane %v93_v24, 4 }
  0x1a   :  { %v48_v33 = vadd.f32 %v47_v25, %v46_v17  ;;  %v55_v34 = vadd.f32 %v54_v26, %v53_v18  ;;  %v68_v35 = vrot.slane %v67_v27, 2  ;;  %v75_v36 = vrot.slane %v74_v28, 2 }
  0x1b   :  { %v62_v37 = vadd.f32 %v61_v29, %v60_v21  ;;  %v82_v38 = vrot.slane %v81_v30, 2  ;;  %v88_v39 = vadd.f32 %v87_v31, %v86_v23  ;;  %v95_v40 = vadd.f32 %v94_v32, %v93_v24 }
  0x1c   :  { %v49_v41 = vrot.slane %v48_v33, 1  ;;  %v56_v42 = vrot.slane %v55_v34, 1  ;;  %v69_v43 = vadd.f32 %v68_v35, %v67_v27  ;;  %v76_v44 = vadd.f32 %v75_v36, %v74_v28 }
  0x1d   :  { %v63_v45 = vrot.slane %v62_v37, 1  ;;  %v83_v46 = vadd.f32 %v82_v38, %v81_v30  ;;  %v89_v47 = vrot.slane %v88_v39, 2  ;;  %v96_v48 = vrot.slane %v95_v40, 2 }
  0x1e   :  { %vm137_vm3 = vcmask 1043459   ;;  %v50_v49 = vadd.f32 %v49_v41, %v48_v33  ;;  %v57_v50 = vadd.f32 %v56_v42, %v55_v34  ;;  %v70_v51 = vrot.slane %v69_v43, 1  ;;  %v160_v41 = vld [vmem:[%s297_s3] sm:$0xff] }
  0x1f   :  { %v77_v52 = vrot.slane %v76_v44, 1  ;;  %v64_v54 = vadd.f32 %v63_v45, %v62_v37  ;;  %v84_v55 = vrot.slane %v83_v46, 1  ;;  %v90_v56 = vadd.f32 %v89_v47, %v88_v39 }
  0x20   :  { %v97_v57 = vadd.f32 %v96_v48, %v95_v40  ;;  %v71_v58 = vadd.f32 %v70_v51, %v69_v43  ;;  %v100_v60 = vmul.f32 0.125, %v50_v49  ;;  %v101_v61 = vmul.f32 0.125, %v57_v50 }
  0x21   :  { %v78_v59 = vadd.f32 %v77_v52, %v76_v44  ;;  %v85_v62 = vadd.f32 %v84_v55, %v83_v46  ;;  %v91_v63 = vrot.slane %v90_v56, 1  ;;  %v102_v1 = vmul.f32 0.125, %v64_v54 }
  0x22   :  { %v98_v0 = vrot.slane %v97_v57, 1  ;;  %v103_v2 = vmul.f32 0.125, %v71_v58  ;;  %v114_v4 = vmul.f32 %v188_v53, %v100_v60  ;;  %v115_v5 = vmul.f32 %v188_v53, %v101_v61 }
  0x23   :  { %v104_v3 = vmul.f32 0.125, %v78_v59  ;;  %v92_v6 = vadd.f32 %v91_v63, %v90_v56  ;;  %v105_v8 = vmul.f32 0.125, %v85_v62  ;;  %v116_v9 = vmul.f32 %v188_v53, %v102_v1 }
  0x24   :  { %v99_v7 = vadd.f32 %v98_v0, %v97_v57  ;;  %v117_v10 = vmul.f32 %v188_v53, %v103_v2  ;;  %v130_v12 = vrot.slane %v115_v5, 7  ;;  %vm140_vm4 = vcmask 1044484  }
  0x25   :  { %v118_v11 = vmul.f32 %v188_v53, %v104_v3  ;;  %v106_v13 = vmul.f32 0.125, %v92_v6  ;;  %v119_v15 = vmul.f32 %v188_v53, %v105_v8  ;;  %v133_v16 = vrot.slane %v116_v9, 6 }
  0x26   :  { %v107_v14 = vmul.f32 0.125, %v99_v7  ;;  %v132_v17 = vsel %vm131_vm1, %v130_v12, %v114_v4  ;;  %v136_v18 = vrot.slane %v117_v10, 5  ;;  %vm143_vm5 = vcmask 1045509  }
  0x27   :  { %v139_v19 = vrot.slane %v118_v11, 4  ;;  %v120_v20 = vmul.f32 %v188_v53, %v106_v13  ;;  %v135_v22 = vsel %vm134_vm2, %v133_v16, %v132_v17  ;;  %v142_v23 = vrot.slane %v119_v15, 3 }
  0x28   :  { %v121_v21 = vmul.f32 %v188_v53, %v107_v14  ;;  %v138_v24 = vsel %vm137_vm3, %v136_v18, %v135_v22  ;;  %vm146_vm6 = vcmask 1046534   ;;  %vm149_vm7 = vcmask 1047559  }
  0x29   :  { %v141_v25 = vsel %vm140_vm4, %v139_v19, %v138_v24  ;;  %v145_v26 = vrot.slane %v120_v20, 2  ;;  %v156_v32 = vstv %s296_s2  ;;  %vm158_vm8 = vcmask 7168  }
  0x2a   :  { %v148_v27 = vrot.slane %v121_v21, 1  ;;  %v144_v28 = vsel %vm143_vm5, %v142_v23, %v141_v25 }
  0x2b   :  { %v147_v29 = vsel %vm146_vm6, %v145_v26, %v144_v28 }
  0x2c   :  { %v150_v30 = vsel %vm149_vm7, %v148_v27, %v147_v29 }
  0x2d   :  { %v152_v31 = vsel %vm43_vm0, %v150_v30, 0.0 }
  0x2e   :  { %153 = vadd.xlane.f32.xlu0 %v152_v31 }
  0xbb   :  { %v154_v33 = vpop.xlane.xlu0 %153 }
  0xbc   :  { %v157_v34 = vadd.f32 %v156_v32, %v154_v33 }
  0xbe   :  { %159 = vst.msk [vmem:[%s298_s4] sm:$0xff] %vm158_vm8, %v157_v34  ;;  %v164_v35 = vand.u32 2147483647, %v157_v34  ;;  %v161_v43 = vmax.f32 %v157_v34, 0.0  ;;  %v162_v44 = vmul.f32 %v160_v41, %v157_v34 }
  0xc0   :  { %v165_v36 = vsub.f32 0.0, %v164_v35  ;;  %v163_v49 = vsub.f32 %v161_v43, %v162_v44 }
  0xc2   :  { %v166_v37 = vmul.f32 1.442695, %v165_v36 }
  0xc4   :  { %192 = vpow2.f32 %v166_v37 }
  0xce   :  { %v193_v38 = vpop.eup %192 }
  0xcf   :  { %v168_v39 = vadd.f32 1.0, %v193_v38  ;;  %v171_v40 = vmul.f32 -0.5, %v193_v38  ;;  %v174_v45 = vand.u32 2147483647, %v193_v38 }
  0xd1   :  { %194 = vlog2.f32 %v168_v39  ;;  %v172_v42 = vadd.f32 1.0, %v171_v40  ;;  %vm175_vm9 = vcmp.lt.f32.partialorder %v174_v45, 0.0004427343 }
  0xd3   :  { %v173_v48 = vmul.f32 %v193_v38, %v172_v42 }
  0xdb   :  { %v195_v46 = vpop.eup %194 }
  0xdc   :  { %v170_v47 = vmul.f32 0.6931472, %v195_v46 }
  0xde   :  { %v176_v50 = vsel %vm175_vm9, %v173_v48, %v170_v47 }
  0xdf   :  { %v177_v51 = vadd.f32 %v176_v50, %v163_v49 }
  0xe1   :  { %178 = vst.msk [vmem:[%s299_s5] sm:$0xff] %vm158_vm8, %v177_v51 }
  0xe2   :  { %187 = vsyncpa [#allocation4], 1 }

</bundles_post_ra>
